<compile_context>
chip_gen: v5e
topology: v5e:2x2
jax: 0.10.0
libtpu: 0.0.40
codegen_flags: <defaults>
</compile_context>

<pallas_src>
import jax
import jax.numpy as jnp
from jax import lax
from jax.experimental import pallas as pl
from jax.experimental.pallas import tpu as pltpu

# ---- model hyper-parameters (small, consistent with the module) -------------
BATCH = 2                       # batch_size
N_STEPS = 16                    # num_steps_input
N_INSTR = 4                     # n_instruments
C_IN = N_INSTR                  # Conv1d in_channels
OC = 64                         # Conv1d out_channels
K = N_STEPS // 2 + 1            # Conv1d kernel_size = 9
L_OUT = N_STEPS - K + 1         # conv output length = num_steps_input // 2 = 8
HID = 32                        # Linear hidden features
CK = C_IN * K                   # 36 (patch width per time step)
FLAT = OC * L_OUT               # 512 (flattened conv features)

# ---- padded (sublane / lane aligned) shapes ----------------------------------
BP = 8          # batch rows padded to one full sublane group
AP = 384        # L_OUT*CK (=288) + 1 ones column = 289 -> pad to 3*128
CONV_W = 640    # FLAT (=512) + 1 ones carrier = 513   -> pad to 5*128
HID_W = 128     # HID (=32) + 1 ones carrier = 33      -> pad to 128
OUT_W = 128     # N_INSTR (=4)                         -> pad to 128


# -----------------------------------------------------------------------------
# Pallas kernel: one grid step for the whole batch; three MXU matmuls + softmax.
# -----------------------------------------------------------------------------
def note_cnn_kernel(a_ref, wbd_ref, w1_ref, w2_ref, o_ref):
    # a_ref  : (BP, AP)        im2col patches per batch row, + ones col, zero pad
    # wbd_ref: (AP, CONV_W)    block-diagonal conv weight (+ conv bias row, carrier)
    # w1_ref : (CONV_W, HID_W) Linear1 weight repacked to t-major flatten (+ b1, carrier)
    # w2_ref : (HID_W, OUT_W)  Linear2 weight (+ b2 via carrier row), zero-padded cols
    # o_ref  : (BP, OUT_W)     softmax probs in cols [0, N_INSTR), garbage-free pad

    # Conv1d (+ bias) as one matmul, ReLU.  Column FLAT carries a constant 1.
    conv = jnp.maximum(
        jnp.dot(a_ref[...], wbd_ref[...], preferred_element_type=jnp.float32), 0.0)

    # Flatten (columns are already t-major by construction) + Linear1 (+ b1), ReLU.
    hid = jnp.maximum(
        jnp.dot(conv, w1_ref[...], preferred_element_type=jnp.float32), 0.0)

    # Linear2 (+ b2).  Only cols [0, N_INSTR) are real logits; padding cols are 0.
    logits = jnp.dot(hid, w2_ref[...], preferred_element_type=jnp.float32)

    # Masked softmax over the first N_INSTR lanes (padding lanes -> prob 0).
    lane = lax.broadcasted_iota(jnp.int32, logits.shape, 1)
    masked = jnp.where(lane < N_INSTR, logits, -1e30)
    m = jnp.max(masked, axis=-1, keepdims=True)
    e = jnp.exp(masked - m)
    denom = jnp.sum(e, axis=-1, keepdims=True)
    o_ref[...] = e * pl.reciprocal(denom, approx=True)


# -----------------------------------------------------------------------------
# Wrapper: parameter re-layout / packing (pure glue) + pallas_call
# -----------------------------------------------------------------------------
@jax.jit
def note_cnn_forward(x_ncl, Wc, bc, W1, b1, W2, b2):
    """x_ncl: (B, C_IN, N_STEPS) float32, PyTorch Conv1d layout."""
    B = x_ncl.shape[0]
    f32 = jnp.float32

    # --- im2col patches: patch[b, t*CK + c*K + k] = x[b, c, t+k] ---------------
    x = x_ncl.astype(f32)
    cols = jnp.stack([x[:, :, t:t + K] for t in range(L_OUT)], axis=1)   # (B,L_OUT,C,K)
    patches = cols.reshape(B, L_OUT * CK)                                # (B, 288)
    A = jnp.concatenate(
        [patches, jnp.ones((B, 1), f32), jnp.zeros((B, AP - L_OUT * CK - 1), f32)],
        axis=1)                                                          # (B, AP)
    A = jnp.concatenate([A, jnp.zeros((BP - B, AP), f32)], axis=0)       # (BP, AP)

    # --- block-diagonal conv weight; output flat index = t*OC + o --------------
    #     built with ONE outer product against eye(L_OUT) (no update-slice loop)
    wc_r = jnp.transpose(Wc.astype(f32), (1, 2, 0)).reshape(CK, OC)      # [c*K+k, o]
    eyeL = jnp.eye(L_OUT, dtype=f32)
    bd_core = (eyeL[:, None, :, None] * wc_r[None, :, None, :]
               ).reshape(L_OUT * CK, FLAT)                               # (288, 512)
    top = jnp.concatenate(
        [bd_core, jnp.zeros((L_OUT * CK, CONV_W - FLAT), f32)], axis=1)  # (288, 640)
    bias_row = jnp.concatenate(
        [jnp.tile(bc.astype(f32), L_OUT),                                # conv bias
         jnp.ones((1,), f32),                                            # ones carrier
         jnp.zeros((CONV_W - FLAT - 1,), f32)])[None, :]                 # (1, 640)
    Wbd = jnp.concatenate(
        [top, bias_row, jnp.zeros((AP - L_OUT * CK - 1, CONV_W), f32)], axis=0)

    # --- Linear1 weight repacked: row t*OC+o <- W1[:, o*L_OUT+t] (torch flatten) ---
    w1_perm = jnp.transpose(W1.astype(f32).reshape(HID, OC, L_OUT),
                            (2, 1, 0)).reshape(FLAT, HID)                # (512, 32)
    W1p = jnp.zeros((CONV_W, HID_W), f32)
    W1p = W1p.at[0:FLAT, 0:HID].set(w1_perm)
    W1p = W1p.at[FLAT, 0:HID].set(b1.astype(f32))                        # b1 via carrier
    W1p = W1p.at[FLAT, HID].set(1.0)                                     # next carrier

    # --- Linear2 weight (+ b2 via carrier row), zero-padded ---------------------
    W2p = jnp.zeros((HID_W, OUT_W), f32)
    W2p = W2p.at[0:HID, 0:N_INSTR].set(W2.astype(f32).T)
    W2p = W2p.at[HID, 0:N_INSTR].set(b2.astype(f32))

    out_pad = pl.pallas_call(
        note_cnn_kernel,
        out_shape=jax.ShapeDtypeStruct((BP, OUT_W), jnp.float32),
        grid=(1,),
        in_specs=[
            pl.BlockSpec((BP, AP), lambda i: (0, 0)),
            pl.BlockSpec((AP, CONV_W), lambda i: (0, 0)),
            pl.BlockSpec((CONV_W, HID_W), lambda i: (0, 0)),
            pl.BlockSpec((HID_W, OUT_W), lambda i: (0, 0)),
        ],
        out_specs=pl.BlockSpec((BP, OUT_W), lambda i: (0, 0)),
        compiler_params=pltpu.CompilerParams(dimension_semantics=("arbitrary",)),
    )(A, Wbd, W1p, W2p)

    # matches `output.view(batch_size, -1)`
    return out_pad[:B, :N_INSTR]


# -----------------------------------------------------------------------------
# Pure-JAX reference (mirrors the PyTorch forward exactly) for a sanity check.
# -----------------------------------------------------------------------------
def reference_forward(x_ncl, Wc, bc, W1, b1, W2, b2):
    cols = jnp.stack([x_ncl[:, :, t:t + K] for t in range(L_OUT)], axis=2)  # (B,C,L_OUT,K)
    conv = jnp.einsum("bctk,ock->bot", cols, Wc) + bc[None, :, None]        # (B,OC,L_OUT)
    conv = jax.nn.relu(conv)
    flat = conv.reshape(x_ncl.shape[0], -1)                                 # (B, FLAT)
    h = jax.nn.relu(flat @ W1.T + b1)
    logits = h @ W2.T + b2
    return jax.nn.softmax(logits, axis=-1)


# -----------------------------------------------------------------------------
def init_params(key):
    """Deterministic, PyTorch-default-style uniform init (shapes from __init__)."""
    ks = jax.random.split(key, 6)

    def uni(k, shape, fan_in):
        bound = 1.0 / jnp.sqrt(jnp.float32(fan_in))
        return jax.random.uniform(k, shape, jnp.float32, -bound, bound)

    Wc = uni(ks[0], (OC, C_IN, K), C_IN * K)          # Conv1d weight
    bc = uni(ks[1], (OC,), C_IN * K)                  # Conv1d bias
    W1 = uni(ks[2], (HID, FLAT), FLAT)                # Linear(512 -> 32)
    b1 = uni(ks[3], (HID,), FLAT)
    W2 = uni(ks[4], (N_INSTR, HID), HID)              # Linear(32 -> n_instruments)
    b2 = uni(ks[5], (N_INSTR,), HID)
    return Wc, bc, W1, b1, W2, b2


if __name__ == "__main__":
    root = jax.random.PRNGKey(0)
    kx, kp = jax.random.split(root)

    x = jax.random.normal(kx, (BATCH, C_IN, N_STEPS), dtype=jnp.float32)  # NCL like torch
    params = init_params(kp)

    out = note_cnn_forward(x, *params)
    out = jax.block_until_ready(out)

    ref = reference_forward(x, *params)
    assert out.shape == (BATCH, N_INSTR), out.shape
    # tolerances allow for the approx (EUP) reciprocal in the softmax epilogue
    assert jnp.allclose(jnp.sum(out, axis=-1), 1.0, atol=5e-3)
    assert jnp.allclose(out, ref, rtol=5e-3, atol=5e-3), (out, ref)

    print("KERNEL_OK")
</pallas_src>

<mosaic_0001>
module attributes {stable_mosaic.version = 11 : i64} {
  func.func @note_cnn_kernel(%arg0: i32, %arg1: memref<8x384xf32, #tpu.memory_space<vmem>>, %arg2: memref<384x640xf32, #tpu.memory_space<vmem>>, %arg3: memref<640x128xf32, #tpu.memory_space<vmem>>, %arg4: memref<128x128xf32, #tpu.memory_space<vmem>>, %arg5: memref<8x128xf32, #tpu.memory_space<vmem>>) attributes {dimension_semantics = [#tpu.dimension_semantics<arbitrary>], iteration_bounds = array<i64: 1>, scalar_prefetch = 0 : i64, scratch_operands = 0 : i64, tpu.core_type = #tpu.core_type<tc>, window_params = [{pipeline_mode = #tpu.pipeline_mode<synchronous>, transform_indices = @transform_0, window_bounds = array<i64: 8, 384>}, {pipeline_mode = #tpu.pipeline_mode<synchronous>, transform_indices = @transform_1, window_bounds = array<i64: 384, 640>}, {pipeline_mode = #tpu.pipeline_mode<synchronous>, transform_indices = @transform_2, window_bounds = array<i64: 640, 128>}, {pipeline_mode = #tpu.pipeline_mode<synchronous>, transform_indices = @transform_3, window_bounds = array<i64: 128, 128>}, {pipeline_mode = #tpu.pipeline_mode<synchronous>, transform_indices = @transform_4, window_bounds = array<i64: 8, 128>}]} {
    %c0 = arith.constant 0 : index
    %c0_0 = arith.constant 0 : index
    %0 = vector.load %arg1[%c0, %c0_0] : memref<8x384xf32, #tpu.memory_space<vmem>>, vector<8x384xf32>
    %c0_1 = arith.constant 0 : index
    %c0_2 = arith.constant 0 : index
    %1 = vector.load %arg2[%c0_1, %c0_2] : memref<384x640xf32, #tpu.memory_space<vmem>>, vector<384x640xf32>
    %cst = arith.constant dense<0.000000e+00> : vector<8x640xf32>
    %2 = tpu.matmul %0, %1, %cst {dimension_numbers = #tpu.dot_dimension_numbers<[1], [0], [0], [1], [0, 0, 1, 1], [], []>} : vector<8x384xf32>, vector<384x640xf32>, vector<8x640xf32> -> vector<8x640xf32>
    %cst_3 = arith.constant 0.000000e+00 : f32
    %3 = vector.broadcast %cst_3 : f32 to vector<8x640xf32>
    %4 = arith.maximumf %2, %3 : vector<8x640xf32>
    %c0_4 = arith.constant 0 : index
    %c0_5 = arith.constant 0 : index
    %5 = vector.load %arg3[%c0_4, %c0_5] : memref<640x128xf32, #tpu.memory_space<vmem>>, vector<640x128xf32>
    %cst_6 = arith.constant dense<0.000000e+00> : vector<8x128xf32>
    %6 = tpu.matmul %4, %5, %cst_6 {dimension_numbers = #tpu.dot_dimension_numbers<[1], [0], [0], [1], [0, 0, 1, 1], [], []>} : vector<8x640xf32>, vector<640x128xf32>, vector<8x128xf32> -> vector<8x128xf32>
    %cst_7 = arith.constant 0.000000e+00 : f32
    %7 = vector.broadcast %cst_7 : f32 to vector<8x128xf32>
    %8 = arith.maximumf %6, %7 : vector<8x128xf32>
    %c0_8 = arith.constant 0 : index
    %c0_9 = arith.constant 0 : index
    %9 = vector.load %arg4[%c0_8, %c0_9] : memref<128x128xf32, #tpu.memory_space<vmem>>, vector<128x128xf32>
    %cst_10 = arith.constant dense<0.000000e+00> : vector<8x128xf32>
    %10 = tpu.matmul %8, %9, %cst_10 {dimension_numbers = #tpu.dot_dimension_numbers<[1], [0], [0], [1], [0, 0, 1, 1], [], []>} : vector<8x128xf32>, vector<128x128xf32>, vector<8x128xf32> -> vector<8x128xf32>
    %11 = tpu.iota {dimensions = array<i32: 1>} : vector<8x128xi32>
    %c4_i32 = arith.constant 4 : i32
    %12 = vector.broadcast %c4_i32 : i32 to vector<8x128xi32>
    %13 = arith.cmpi slt, %11, %12 : vector<8x128xi32>
    %cst_11 = arith.constant -1.000000e+30 : f32
    %14 = vector.broadcast %cst_11 : f32 to vector<8x128xf32>
    %15 = arith.select %13, %10, %14 : vector<8x128xi1>, vector<8x128xf32>
    %cst_12 = arith.constant dense<0xFF800000> : vector<8xf32>
    %16 = vector.multi_reduction <maximumf>, %15, %cst_12 [1] : vector<8x128xf32> to vector<8xf32>
    %17 = vector.shape_cast %16 : vector<8xf32> to vector<8x1xf32>
    %18 = vector.broadcast %17 : vector<8x1xf32> to vector<8x128xf32>
    %19 = arith.subf %15, %18 : vector<8x128xf32>
    %20 = math.exp %19 : vector<8x128xf32>
    %cst_13 = arith.constant dense<0.000000e+00> : vector<8xf32>
    %21 = vector.multi_reduction <add>, %20, %cst_13 [1] : vector<8x128xf32> to vector<8xf32>
    %22 = vector.shape_cast %21 : vector<8xf32> to vector<8x1xf32>
    %23 = tpu.reciprocal %22 {approx = true} : vector<8x1xf32> -> vector<8x1xf32>
    %24 = vector.broadcast %23 : vector<8x1xf32> to vector<8x128xf32>
    %25 = arith.mulf %20, %24 : vector<8x128xf32>
    %c0_14 = arith.constant 0 : index
    %c0_15 = arith.constant 0 : index
    %26 = vector.load %arg5[%c0_14, %c0_15] : memref<8x128xf32, #tpu.memory_space<vmem>>, vector<8x128xf32>
    tpu.vector_store %arg5[%c0_14, %c0_15], %25 {strides = array<i32>} : memref<8x128xf32, #tpu.memory_space<vmem>>, vector<8x128xf32>,
    return
  }
  func.func @transform_0(%arg0: i32) -> (i32, i32) {
    %c0_i32 = arith.constant 0 : i32
    %c0_i32_0 = arith.constant 0 : i32
    %c0_i32_1 = arith.constant 0 : i32
    return %c0_i32, %c0_i32_0 : i32, i32
  }
  func.func @transform_1(%arg0: i32) -> (i32, i32) {
    %c0_i32 = arith.constant 0 : i32
    %c0_i32_0 = arith.constant 0 : i32
    %c0_i32_1 = arith.constant 0 : i32
    return %c0_i32, %c0_i32_0 : i32, i32
  }
  func.func @transform_2(%arg0: i32) -> (i32, i32) {
    %c0_i32 = arith.constant 0 : i32
    %c0_i32_0 = arith.constant 0 : i32
    %c0_i32_1 = arith.constant 0 : i32
    return %c0_i32, %c0_i32_0 : i32, i32
  }
  func.func @transform_3(%arg0: i32) -> (i32, i32) {
    %c0_i32 = arith.constant 0 : i32
    %c0_i32_0 = arith.constant 0 : i32
    %c0_i32_1 = arith.constant 0 : i32
    return %c0_i32, %c0_i32_0 : i32, i32
  }
  func.func @transform_4(%arg0: i32) -> (i32, i32) {
    %c0_i32 = arith.constant 0 : i32
    %c0_i32_0 = arith.constant 0 : i32
    %c0_i32_1 = arith.constant 0 : i32
    return %c0_i32, %c0_i32_0 : i32, i32
  }
}

</mosaic_0001>

<bundles_post_ra>
// kernel: mul.11
= control target key start
LH: loop header
LB: loop body
LE: loop exit
PB: predicated region body
PF: predicated region fallthrough
CT: control target
= control target key end

     0   :  { %vm3_vm0 = vcmask 523264   ;;  %s6_s6 = smov 3  ;;  %s22_s7 = smov 3  ;;  %s88_s0 = inlined_call_operand.vmem [shape: f32[4,9,64], index: 0, kind: input, shape index: {}]   ;;  %s89_s1 = inlined_call_operand.vmem [shape: f32[36,64], index: 1, kind: output, shape index: {}]  }
   0x1   :  { %v2_v0 = vld [vmem:[%s88_s0] sm:$0xff]   ;;  %v34_v2 = vld [vmem:[%s88_s0 + $0x11] sm:$0xff]  }
   0x2   :  { %v32_v1 = vld [vmem:[%s88_s0 + $0x8] ss:$8 sm:%s6_s6]   ;;  %4 = vst.msk [vmem:[%s89_s1] sm:$0xff] %vm3_vm0, %v2_v0  }
   0x3   :  { %v36_v3 = vld [vmem:[%s88_s0 + $0x20] sm:$0xff]   ;;  %33 = vst.msk [vmem:[%s89_s1 + $0x8] sm:$0x3] %vm3_vm0, %v32_v1   ;;  %v40_v5 = vld [vmem:[%s88_s0 + $0x31] sm:$0xff]  }
   0x4   :  { %v38_v4 = vld [vmem:[%s88_s0 + $0x28] ss:$8 sm:%s22_s7]   ;;  %35 = vst.msk [vmem:[%s89_s1 + $0xa] sm:$0xff] %vm3_vm0, %v34_v2  }
   0x5   :  { %37 = vst.msk [vmem:[%s89_s1 + $0x12] sm:$0xff] %vm3_vm0, %v36_v3  }
   0x6   :  { %39 = vst.msk [vmem:[%s89_s1 + $0x1a] sm:$0x3] %vm3_vm0, %v38_v4  }
   0x7   :  { %41 = vst.msk [vmem:[%s89_s1 + $0x1c] sm:$0xff] %vm3_vm0, %v40_v5  }

// kernel: tile.8
= control target key start
LH: loop header
LB: loop body
LE: loop exit
PB: predicated region body
PF: predicated region fallthrough
CT: control target
= control target key end

     0   :  { %s22_s0 = inlined_call_operand.vmem [shape: f32[64], index: 0, kind: input, shape index: {}]   ;;  %s23_s1 = inlined_call_operand.vmem [shape: f32[8,64], index: 1, kind: output, shape index: {}]  }
   0x1   :  { %v4_v0 = vld [vmem:[%s22_s0] ss:$0 sm:$0xff] }
   0x2   :  { %5 = vst [vmem:[%s23_s1] sm:$0xff] %v4_v0 }

// kernel: tile.9
= control target key start
LH: loop header
LB: loop body
LE: loop exit
PB: predicated region body
PF: predicated region fallthrough
CT: control target
= control target key end

     0   :  { %vm3_vm0 = vcmask 523264   ;;  %s19_s8 = smov 64   ;;  %vm9_vm1 = vcmask 1048064   ;;  %s39_s0 = inlined_call_operand.vmem [shape: f32[8,64], index: 0, kind: input, shape index: {}]   ;;  %s40_s1 = inlined_call_operand.vmem [shape: f32[512], index: 1, kind: output, shape index: {}]  }
   0x1   :  { %v17_v0 = vld [vmem:[%s39_s0 + $0x1] ss:$2 sm:$0xf]   ;;  %v2_v1 = vld [vmem:[%s39_s0] ss:$2 sm:$0xf]  }
   0x2   :  { %7 = vrot.lane.b32.xlu0 %v17_v0, %s19_s8  ;;  %4 = vst.msk [vmem:[#allocation0] sm:$0xf] %vm3_vm0, %v2_v1  }
  0x74   :  { %v8_v2 = vpop.permute.xlu0 %7  }
  0x75   :  { %10 = vst.msk [vmem:[#allocation0] sm:$0xf] %vm9_vm1, %v8_v2  }
  0x7c   :  { %v13_v3 = vld [vmem:[#allocation0] sm:$0xf] }
  0x7d   :  { %16 = vst [vmem:[%s40_s1] sm:$0xf] %v13_v3 }

// kernel: note_cnn_forward.1
= control target key start
LH: loop header
LB: loop body
LE: loop exit
PB: predicated region body
PF: predicated region fallthrough
CT: control target
= control target key end

     0   :  { %s1870_s1 = inlined_call_operand.vmem [shape: f32[384,640], index: 1, kind: input, shape index: {}]   ;;  %s1871_s0 = inlined_call_operand.vmem [shape: f32[8,384], index: 0, kind: input, shape index: {}]   ;;  %s1872_s2 = inlined_call_operand.vmem [shape: f32[640,128], index: 2, kind: input, shape index: {}]   ;;  %s1873_s3 = inlined_call_operand.vmem [shape: f32[128,128], index: 3, kind: input, shape index: {}]   ;;  %s1874_s4 = inlined_call_operand.vmem [shape: f32[8,128], index: 4, kind: output, shape index: {}]  }
   0x1   :  { %v95_v0 = vld [vmem:[%s1870_s1 + $0x258] sm:$0xff]  ;;  %v90_v2 = vld [vmem:[%s1870_s1 + $0x230] sm:$0xff]  ;;  %v96_v4 = vld [vmem:[%s1870_s1 + $0x260] sm:$0xff] }
   0x2   :  { %v255_v1 = vld [vmem:[%s1870_s1 + $0x758] sm:$0xff]  ;;  %260 = vmatpush.msra.mxu0 %v95_v0  ;;  %v250_v3 = vld [vmem:[%s1870_s1 + $0x730] sm:$0xff]  ;;  %v85_v5 = vld [vmem:[%s1870_s1 + $0x208] sm:$0xff]  ;;  %320 = vmatpush.msra.mxu3 %v96_v4 }
   0x3   :  { %300 = vmatpush.msra.mxu2 %v255_v1  ;;  %v175_v6 = vld [vmem:[%s1870_s1 + $0x4d8] sm:$0xff]  ;;  %v245_v7 = vld [vmem:[%s1870_s1 + $0x708] sm:$0xff]  ;;  %v170_v9 = vld [vmem:[%s1870_s1 + $0x4b0] sm:$0xff] }
   0x4   :  { %v91_v8 = vld [vmem:[%s1870_s1 + $0x238] sm:$0xff]  ;;  %261 = vmatpush.msra.mxu0 %v90_v2  ;;  %280 = vmatpush.msra.mxu1 %v175_v6  ;;  %v80_v10 = vld [vmem:[%s1870_s1 + $0x1e0] sm:$0xff]  ;;  %v86_v12 = vld [vmem:[%s1870_s1 + $0x210] sm:$0xff] }
   0x5   :  { %301 = vmatpush.msra.mxu2 %v250_v3  ;;  %321 = vmatpush.msra.mxu3 %v91_v8  ;;  %v240_v11 = vld [vmem:[%s1870_s1 + $0x6e0] sm:$0xff]  ;;  %v165_v13 = vld [vmem:[%s1870_s1 + $0x488] sm:$0xff]  ;;  %v75_v15 = vld [vmem:[%s1870_s1 + $0x1b8] sm:$0xff] }
   0x6   :  { %262 = vmatpush.msra.mxu0 %v85_v5  ;;  %v81_v14 = vld [vmem:[%s1870_s1 + $0x1e8] sm:$0xff]  ;;  %281 = vmatpush.msra.mxu1 %v170_v9  ;;  %v235_v16 = vld [vmem:[%s1870_s1 + $0x6b8] sm:$0xff]  ;;  %v160_v17 = vld [vmem:[%s1870_s1 + $0x460] sm:$0xff] }
   0x7   :  { %302 = vmatpush.msra.mxu2 %v245_v7  ;;  %322 = vmatpush.msra.mxu3 %v86_v12  ;;  %v76_v18 = vld [vmem:[%s1870_s1 + $0x1c0] sm:$0xff]  ;;  %v70_v19 = vld [vmem:[%s1870_s1 + $0x190] sm:$0xff]  ;;  %v155_v21 = vld [vmem:[%s1870_s1 + $0x438] sm:$0xff] }
   0x8   :  { %263 = vmatpush.msra.mxu0 %v80_v10  ;;  %282 = vmatpush.msra.mxu1 %v165_v13  ;;  %v230_v20 = vld [vmem:[%s1870_s1 + $0x690] sm:$0xff]  ;;  %v71_v22 = vld [vmem:[%s1870_s1 + $0x198] sm:$0xff]  ;;  %v65_v23 = vld [vmem:[%s1870_s1 + $0x168] sm:$0xff] }
   0x9   :  { %303 = vmatpush.msra.mxu2 %v240_v11  ;;  %323 = vmatpush.msra.mxu3 %v81_v14  ;;  %v225_v24 = vld [vmem:[%s1870_s1 + $0x668] sm:$0xff]  ;;  %v150_v25 = vld [vmem:[%s1870_s1 + $0x410] sm:$0xff]  ;;  %v60_v27 = vld [vmem:[%s1870_s1 + $0x140] sm:$0xff] }
   0xa   :  { %264 = vmatpush.msra.mxu0 %v75_v15  ;;  %283 = vmatpush.msra.mxu1 %v160_v17  ;;  %v66_v26 = vld [vmem:[%s1870_s1 + $0x170] sm:$0xff]  ;;  %v220_v28 = vld [vmem:[%s1870_s1 + $0x640] sm:$0xff]  ;;  %v145_v29 = vld [vmem:[%s1870_s1 + $0x3e8] sm:$0xff] }
   0xb   :  { %304 = vmatpush.msra.mxu2 %v235_v16  ;;  %324 = vmatpush.msra.mxu3 %v76_v18  ;;  %v61_v30 = vld [vmem:[%s1870_s1 + $0x148] sm:$0xff]  ;;  %v55_v31 = vld [vmem:[%s1870_s1 + $0x118] sm:$0xff]  ;;  %v140_v33 = vld [vmem:[%s1870_s1 + $0x3c0] sm:$0xff] }
   0xc   :  { %265 = vmatpush.msra.mxu0 %v70_v19  ;;  %284 = vmatpush.msra.mxu1 %v155_v21  ;;  %v215_v32 = vld [vmem:[%s1870_s1 + $0x618] sm:$0xff]  ;;  %v56_v34 = vld [vmem:[%s1870_s1 + $0x120] sm:$0xff]  ;;  %v50_v35 = vld [vmem:[%s1870_s1 + $0xf0] sm:$0xff] }
   0xd   :  { %305 = vmatpush.msra.mxu2 %v230_v20  ;;  %325 = vmatpush.msra.mxu3 %v71_v22  ;;  %v210_v36 = vld [vmem:[%s1870_s1 + $0x5f0] sm:$0xff]  ;;  %v135_v37 = vld [vmem:[%s1870_s1 + $0x398] sm:$0xff]  ;;  %v45_v39 = vld [vmem:[%s1870_s1 + $0xc8] sm:$0xff] }
   0xe   :  { %266 = vmatpush.msra.mxu0 %v65_v23  ;;  %285 = vmatpush.msra.mxu1 %v150_v25  ;;  %v51_v38 = vld [vmem:[%s1870_s1 + $0xf8] sm:$0xff]  ;;  %v205_v40 = vld [vmem:[%s1870_s1 + $0x5c8] sm:$0xff]  ;;  %v130_v41 = vld [vmem:[%s1870_s1 + $0x370] sm:$0xff] }
   0xf   :  { %306 = vmatpush.msra.mxu2 %v225_v24  ;;  %326 = vmatpush.msra.mxu3 %v66_v26  ;;  %v46_v42 = vld [vmem:[%s1870_s1 + $0xd0] sm:$0xff]  ;;  %v40_v43 = vld [vmem:[%s1870_s1 + $0xa0] sm:$0xff]  ;;  %v125_v45 = vld [vmem:[%s1870_s1 + $0x348] sm:$0xff] }
  0x10   :  { %267 = vmatpush.msra.mxu0 %v60_v27  ;;  %286 = vmatpush.msra.mxu1 %v145_v29  ;;  %v200_v44 = vld [vmem:[%s1870_s1 + $0x5a0] sm:$0xff]  ;;  %v41_v46 = vld [vmem:[%s1870_s1 + $0xa8] sm:$0xff]  ;;  %v35_v47 = vld [vmem:[%s1870_s1 + $0x78] sm:$0xff] }
  0x11   :  { %307 = vmatpush.msra.mxu2 %v220_v28  ;;  %327 = vmatpush.msra.mxu3 %v61_v30  ;;  %v195_v48 = vld [vmem:[%s1870_s1 + $0x578] sm:$0xff]  ;;  %v120_v49 = vld [vmem:[%s1870_s1 + $0x320] sm:$0xff]  ;;  %v30_v51 = vld [vmem:[%s1870_s1 + $0x50] sm:$0xff] }
  0x12   :  { %268 = vmatpush.msra.mxu0 %v55_v31  ;;  %287 = vmatpush.msra.mxu1 %v140_v33  ;;  %v36_v50 = vld [vmem:[%s1870_s1 + $0x80] sm:$0xff]  ;;  %v190_v52 = vld [vmem:[%s1870_s1 + $0x550] sm:$0xff]  ;;  %v115_v53 = vld [vmem:[%s1870_s1 + $0x2f8] sm:$0xff] }
  0x13   :  { %308 = vmatpush.msra.mxu2 %v215_v32  ;;  %328 = vmatpush.msra.mxu3 %v56_v34  ;;  %v31_v54 = vld [vmem:[%s1870_s1 + $0x58] sm:$0xff]  ;;  %v25_v55 = vld [vmem:[%s1870_s1 + $0x28] sm:$0xff]  ;;  %v110_v57 = vld [vmem:[%s1870_s1 + $0x2d0] sm:$0xff] }
  0x14   :  { %269 = vmatpush.msra.mxu0 %v50_v35  ;;  %288 = vmatpush.msra.mxu1 %v135_v37  ;;  %v185_v56 = vld [vmem:[%s1870_s1 + $0x528] sm:$0xff]  ;;  %v26_v58 = vld [vmem:[%s1870_s1 + $0x30] sm:$0xff]  ;;  %v20_v59 = vld [vmem:[%s1870_s1] sm:$0xff] }
  0x15   :  { %309 = vmatpush.msra.mxu2 %v210_v36  ;;  %329 = vmatpush.msra.mxu3 %v51_v38  ;;  %v180_v60 = vld [vmem:[%s1870_s1 + $0x500] sm:$0xff]  ;;  %v97_v62 = vld [vmem:[%s1870_s1 + $0x268] sm:$0xff]  ;;  %v171_v1 = vld [vmem:[%s1870_s1 + $0x4b8] sm:$0xff] }
  0x16   :  { %270 = vmatpush.msra.mxu0 %v45_v39  ;;  %289 = vmatpush.msra.mxu1 %v130_v41  ;;  %v176_v61 = vld [vmem:[%s1870_s1 + $0x4e0] sm:$0xff]  ;;  %v105_v63 = vld [vmem:[%s1870_s1 + $0x2a8] sm:$0xff]  ;;  %v166_v5 = vld [vmem:[%s1870_s1 + $0x490] sm:$0xff] }
  0x17   :  { %310 = vmatpush.msra.mxu2 %v205_v40  ;;  %330 = vmatpush.msra.mxu3 %v46_v42  ;;  %v21_v0 = vld [vmem:[%s1870_s1 + $0x8] sm:$0xff]  ;;  %v92_v2 = vld [vmem:[%s1870_s1 + $0x240] sm:$0xff]  ;;  %v87_v7 = vld [vmem:[%s1870_s1 + $0x218] sm:$0xff] }
  0x18   :  { %271 = vmatpush.msra.mxu0 %v40_v43  ;;  %290 = vmatpush.msra.mxu1 %v125_v45  ;;  %v177_v3 = vld [vmem:[%s1870_s1 + $0x4e8] sm:$0xff]  ;;  %v100_v4 = vld [vmem:[%s1870_s1 + $0x280] sm:$0xff]  ;;  %v251_v10 = vld [vmem:[%s1870_s1 + $0x738] sm:$0xff] }
  0x19   :  { %311 = vmatpush.msra.mxu2 %v200_v44  ;;  %331 = vmatpush.msra.mxu3 %v41_v46  ;;  %v256_v6 = vld [vmem:[%s1870_s1 + $0x760] sm:$0xff]  ;;  %v161_v9 = vld [vmem:[%s1870_s1 + $0x468] sm:$0xff]  ;;  %v82_v11 = vld [vmem:[%s1870_s1 + $0x1f0] sm:$0xff] }
  0x1a   :  { %272 = vmatpush.msra.mxu0 %v35_v47  ;;  %291 = vmatpush.msra.mxu1 %v120_v49  ;;  %v172_v8 = vld [vmem:[%s1870_s1 + $0x4c0] sm:$0xff]  ;;  %v167_v12 = vld [vmem:[%s1870_s1 + $0x498] sm:$0xff]  ;;  %v246_v14 = vld [vmem:[%s1870_s1 + $0x710] sm:$0xff] }
  0x1b   :  { %312 = vmatpush.msra.mxu2 %v195_v48  ;;  %332 = vmatpush.msra.mxu3 %v36_v50  ;;  %v156_v13 = vld [vmem:[%s1870_s1 + $0x440] sm:$0xff]  ;;  %v77_v15 = vld [vmem:[%s1870_s1 + $0x1c8] sm:$0xff]  ;;  %v162_v16 = vld [vmem:[%s1870_s1 + $0x470] sm:$0xff] }
  0x1c   :  { %273 = vmatpush.msra.mxu0 %v30_v51  ;;  %292 = vmatpush.msra.mxu1 %v115_v53  ;;  %v151_v17 = vld [vmem:[%s1870_s1 + $0x418] sm:$0xff]  ;;  %v241_v18 = vld [vmem:[%s1870_s1 + $0x6e8] sm:$0xff]  ;;  %v72_v19 = vld [vmem:[%s1870_s1 + $0x1a0] sm:$0xff] }
  0x1d   :  { %313 = vmatpush.msra.mxu2 %v190_v52  ;;  %333 = vmatpush.msra.mxu3 %v31_v54  ;;  %v157_v20 = vld [vmem:[%s1870_s1 + $0x448] sm:$0xff]  ;;  %v146_v21 = vld [vmem:[%s1870_s1 + $0x3f0] sm:$0xff]  ;;  %v236_v22 = vld [vmem:[%s1870_s1 + $0x6c0] sm:$0xff] }
  0x1e   :  { %274 = vmatpush.msra.mxu0 %v25_v55  ;;  %293 = vmatpush.msra.mxu1 %v110_v57  ;;  %v67_v23 = vld [vmem:[%s1870_s1 + $0x178] sm:$0xff]  ;;  %v152_v24 = vld [vmem:[%s1870_s1 + $0x420] sm:$0xff]  ;;  %v141_v25 = vld [vmem:[%s1870_s1 + $0x3c8] sm:$0xff] }
  0x1f   :  { %314 = vmatpush.msra.mxu2 %v185_v56  ;;  %334 = vmatpush.msra.mxu3 %v26_v58  ;;  %v231_v26 = vld [vmem:[%s1870_s1 + $0x698] sm:$0xff]  ;;  %v62_v27 = vld [vmem:[%s1870_s1 + $0x150] sm:$0xff]  ;;  %v136_v29 = vld [vmem:[%s1870_s1 + $0x3a0] sm:$0xff] }
  0x20   :  { %275 = vmatpush.msra.mxu0 %v20_v59  ;;  %294 = vmatpush.msra.mxu1 %v105_v63  ;;  %v147_v28 = vld [vmem:[%s1870_s1 + $0x3f8] sm:$0xff]  ;;  %v226_v30 = vld [vmem:[%s1870_s1 + $0x670] sm:$0xff]  ;;  %v57_v31 = vld [vmem:[%s1870_s1 + $0x128] sm:$0xff] }
  0x21   :  { %315 = vmatpush.msra.mxu2 %v180_v60  ;;  %335 = vmatpush.msra.mxu3 %v21_v0  ;;  %v142_v32 = vld [vmem:[%s1870_s1 + $0x3d0] sm:$0xff]  ;;  %v131_v33 = vld [vmem:[%s1870_s1 + $0x378] sm:$0xff]  ;;  %v221_v34 = vld [vmem:[%s1870_s1 + $0x648] sm:$0xff] }
  0x22   :  { %340 = vmatpush.msrb.mxu0 %v176_v61  ;;  %295 = vmatpush.msra.mxu1 %v100_v4  ;;  %v52_v35 = vld [vmem:[%s1870_s1 + $0x100] sm:$0xff]  ;;  %v137_v36 = vld [vmem:[%s1870_s1 + $0x3a8] sm:$0xff]  ;;  %v126_v37 = vld [vmem:[%s1870_s1 + $0x350] sm:$0xff] }
  0x23   :  { %380 = vmatpush.msrb.mxu2 %v97_v62  ;;  %400 = vmatpush.msrb.mxu3 %v177_v3  ;;  %v216_v38 = vld [vmem:[%s1870_s1 + $0x620] sm:$0xff]  ;;  %v47_v39 = vld [vmem:[%s1870_s1 + $0xd8] sm:$0xff]  ;;  %v121_v41 = vld [vmem:[%s1870_s1 + $0x328] sm:$0xff] }
  0x24   :  { %341 = vmatpush.msrb.mxu0 %v171_v1  ;;  %360 = vmatpush.msrb.mxu1 %v256_v6  ;;  %v132_v40 = vld [vmem:[%s1870_s1 + $0x380] sm:$0xff]  ;;  %v211_v42 = vld [vmem:[%s1870_s1 + $0x5f8] sm:$0xff]  ;;  %v42_v43 = vld [vmem:[%s1870_s1 + $0xb0] sm:$0xff] }
  0x25   :  { %381 = vmatpush.msrb.mxu2 %v92_v2  ;;  %401 = vmatpush.msrb.mxu3 %v172_v8  ;;  %v127_v44 = vld [vmem:[%s1870_s1 + $0x358] sm:$0xff]  ;;  %v116_v45 = vld [vmem:[%s1870_s1 + $0x300] sm:$0xff]  ;;  %v206_v46 = vld [vmem:[%s1870_s1 + $0x5d0] sm:$0xff] }
  0x26   :  { %342 = vmatpush.msrb.mxu0 %v166_v5  ;;  %361 = vmatpush.msrb.mxu1 %v251_v10  ;;  %v37_v47 = vld [vmem:[%s1870_s1 + $0x88] sm:$0xff]  ;;  %v122_v48 = vld [vmem:[%s1870_s1 + $0x330] sm:$0xff]  ;;  %v111_v49 = vld [vmem:[%s1870_s1 + $0x2d8] sm:$0xff] }
  0x27   :  { %382 = vmatpush.msrb.mxu2 %v87_v7  ;;  %402 = vmatpush.msrb.mxu3 %v167_v12  ;;  %v201_v50 = vld [vmem:[%s1870_s1 + $0x5a8] sm:$0xff]  ;;  %v32_v51 = vld [vmem:[%s1870_s1 + $0x60] sm:$0xff]  ;;  %v106_v53 = vld [vmem:[%s1870_s1 + $0x2b0] sm:$0xff] }
  0x28   :  { %343 = vmatpush.msrb.mxu0 %v161_v9  ;;  %362 = vmatpush.msrb.mxu1 %v246_v14  ;;  %v117_v52 = vld [vmem:[%s1870_s1 + $0x308] sm:$0xff]  ;;  %v196_v54 = vld [vmem:[%s1870_s1 + $0x580] sm:$0xff]  ;;  %v27_v55 = vld [vmem:[%s1870_s1 + $0x38] sm:$0xff] }
  0x29   :  { %383 = vmatpush.msrb.mxu2 %v82_v11  ;;  %403 = vmatpush.msrb.mxu3 %v162_v16  ;;  %v112_v56 = vld [vmem:[%s1870_s1 + $0x2e0] sm:$0xff]  ;;  %v101_v57 = vld [vmem:[%s1870_s1 + $0x288] sm:$0xff]  ;;  %v191_v58 = vld [vmem:[%s1870_s1 + $0x558] sm:$0xff] }
  0x2a   :  { %344 = vmatpush.msrb.mxu0 %v156_v13  ;;  %363 = vmatpush.msrb.mxu1 %v241_v18  ;;  %v22_v59 = vld [vmem:[%s1870_s1 + $0x10] sm:$0xff]  ;;  %v107_v60 = vld [vmem:[%s1870_s1 + $0x2b8] sm:$0xff]  ;;  %v1207_v61 = vld [vmem:[%s1871_s0] sm:$0xff] }
  0x2b   :  { %384 = vmatpush.msrb.mxu2 %v77_v15  ;;  %404 = vmatpush.msrb.mxu3 %v157_v20  ;;  %v1212_v62 = vld [vmem:[%s1871_s0 + $0x10] sm:$0xff]  ;;  %v257_v63 = vld [vmem:[%s1870_s1 + $0x768] sm:$0xff]  ;;  %v252_v3 = vld [vmem:[%s1870_s1 + $0x740] sm:$0xff] }
  0x2c   :  { %345 = vmatpush.msrb.mxu0 %v151_v17  ;;  %364 = vmatpush.msrb.mxu1 %v236_v22  ;;  %v178_v0 = vld [vmem:[%s1870_s1 + $0x4f0] sm:$0xff]  ;;  %v173_v4 = vld [vmem:[%s1870_s1 + $0x4c8] sm:$0xff]  ;;  %v247_v7 = vld [vmem:[%s1870_s1 + $0x718] sm:$0xff] }
  0x2d   :  { %385 = vmatpush.msrb.mxu2 %v72_v19  ;;  %405 = vmatpush.msrb.mxu3 %v152_v24  ;;  %v186_v1 = vld [vmem:[%s1870_s1 + $0x530] sm:$0xff]  ;;  %v181_v6 = vld [vmem:[%s1870_s1 + $0x508] sm:$0xff]  ;;  %v168_v9 = vld [vmem:[%s1870_s1 + $0x4a0] sm:$0xff] }
  0x2e   :  { %346 = vmatpush.msrb.mxu0 %v146_v21  ;;  %365 = vmatpush.msrb.mxu1 %v231_v26  ;;  %v102_v2 = vld [vmem:[%s1870_s1 + $0x290] sm:$0xff]  ;;  %v1247_v8 = vld [vmem:[%s1871_s0 + $0x8] sm:$0xff]  ;;  %v163_v13 = vld [vmem:[%s1870_s1 + $0x478] sm:$0xff] }
  0x2f   :  { %386 = vmatpush.msrb.mxu2 %v67_v23  ;;  %406 = vmatpush.msrb.mxu3 %v147_v28  ;;  %v258_v5 = vld [vmem:[%s1870_s1 + $0x770] sm:$0xff]  ;;  %v253_v11 = vld [vmem:[%s1870_s1 + $0x748] sm:$0xff]  ;;  %v248_v15 = vld [vmem:[%s1870_s1 + $0x720] sm:$0xff] }
  0x30   :  { %347 = vmatpush.msrb.mxu0 %v141_v25  ;;  %366 = vmatpush.msrb.mxu1 %v226_v30  ;;  %v98_v10 = vld [vmem:[%s1870_s1 + $0x270] sm:$0xff]  ;;  %v93_v14 = vld [vmem:[%s1870_s1 + $0x248] sm:$0xff]  ;;  %v88_v18 = vld [vmem:[%s1870_s1 + $0x220] sm:$0xff] }
  0x31   :  { %387 = vmatpush.msrb.mxu2 %v62_v27  ;;  %407 = vmatpush.msrb.mxu3 %v142_v32  ;;  %v242_v12 = vld [vmem:[%s1870_s1 + $0x6f0] sm:$0xff]  ;;  %v237_v16 = vld [vmem:[%s1870_s1 + $0x6c8] sm:$0xff]  ;;  %v243_v19 = vld [vmem:[%s1870_s1 + $0x6f8] sm:$0xff] }
  0x32   :  { %348 = vmatpush.msrb.mxu0 %v136_v29  ;;  %367 = vmatpush.msrb.mxu1 %v221_v34  ;;  %v158_v17 = vld [vmem:[%s1870_s1 + $0x450] sm:$0xff]  ;;  %v153_v20 = vld [vmem:[%s1870_s1 + $0x428] sm:$0xff]  ;;  %v232_v21 = vld [vmem:[%s1870_s1 + $0x6a0] sm:$0xff] }
  0x33   :  { %388 = vmatpush.msrb.mxu2 %v57_v31  ;;  %408 = vmatpush.msrb.mxu3 %v137_v36  ;;  %v83_v22 = vld [vmem:[%s1870_s1 + $0x1f8] sm:$0xff]  ;;  %v238_v23 = vld [vmem:[%s1870_s1 + $0x6d0] sm:$0xff]  ;;  %v148_v26 = vld [vmem:[%s1870_s1 + $0x400] sm:$0xff] }
  0x34   :  { %349 = vmatpush.msrb.mxu0 %v131_v33  ;;  %368 = vmatpush.msrb.mxu1 %v216_v38  ;;  %v227_v24 = vld [vmem:[%s1870_s1 + $0x678] sm:$0xff]  ;;  %v78_v25 = vld [vmem:[%s1870_s1 + $0x1d0] sm:$0xff]  ;;  %v233_v27 = vld [vmem:[%s1870_s1 + $0x6a8] sm:$0xff] }
  0x35   :  { %389 = vmatpush.msrb.mxu2 %v52_v35  ;;  %409 = vmatpush.msrb.mxu3 %v132_v40  ;;  %v222_v28 = vld [vmem:[%s1870_s1 + $0x650] sm:$0xff]  ;;  %v73_v29 = vld [vmem:[%s1870_s1 + $0x1a8] sm:$0xff]  ;;  %v143_v30 = vld [vmem:[%s1870_s1 + $0x3d8] sm:$0xff] }
  0x36   :  { %350 = vmatpush.msrb.mxu0 %v126_v37  ;;  %369 = vmatpush.msrb.mxu1 %v211_v42  ;;  %v228_v31 = vld [vmem:[%s1870_s1 + $0x680] sm:$0xff]  ;;  %v217_v32 = vld [vmem:[%s1870_s1 + $0x628] sm:$0xff]  ;;  %v138_v34 = vld [vmem:[%s1870_s1 + $0x3b0] sm:$0xff] }
  0x37   :  { %390 = vmatpush.msrb.mxu2 %v47_v39  ;;  %410 = vmatpush.msrb.mxu3 %v127_v44  ;;  %v68_v33 = vld [vmem:[%s1870_s1 + $0x180] sm:$0xff]  ;;  %v223_v35 = vld [vmem:[%s1870_s1 + $0x658] sm:$0xff]  ;;  %v133_v38 = vld [vmem:[%s1870_s1 + $0x388] sm:$0xff] }
  0x38   :  { %351 = vmatpush.msrb.mxu0 %v121_v41  ;;  %370 = vmatpush.msrb.mxu1 %v206_v46  ;;  %v212_v36 = vld [vmem:[%s1870_s1 + $0x600] sm:$0xff]  ;;  %v63_v37 = vld [vmem:[%s1870_s1 + $0x158] sm:$0xff]  ;;  %v218_v39 = vld [vmem:[%s1870_s1 + $0x630] sm:$0xff] }
  0x39   :  { %391 = vmatpush.msrb.mxu2 %v42_v43  ;;  %411 = vmatpush.msrb.mxu3 %v122_v48  ;;  %v207_v40 = vld [vmem:[%s1870_s1 + $0x5d8] sm:$0xff]  ;;  %v58_v41 = vld [vmem:[%s1870_s1 + $0x130] sm:$0xff]  ;;  %v128_v42 = vld [vmem:[%s1870_s1 + $0x360] sm:$0xff] }
  0x3a   :  { %352 = vmatpush.msrb.mxu0 %v116_v45  ;;  %371 = vmatpush.msrb.mxu1 %v201_v50  ;;  %v213_v43 = vld [vmem:[%s1870_s1 + $0x608] sm:$0xff]  ;;  %v202_v44 = vld [vmem:[%s1870_s1 + $0x5b0] sm:$0xff]  ;;  %v123_v46 = vld [vmem:[%s1870_s1 + $0x338] sm:$0xff] }
  0x3b   :  { %392 = vmatpush.msrb.mxu2 %v37_v47  ;;  %412 = vmatpush.msrb.mxu3 %v117_v52  ;;  %v53_v45 = vld [vmem:[%s1870_s1 + $0x108] sm:$0xff]  ;;  %v208_v47 = vld [vmem:[%s1870_s1 + $0x5e0] sm:$0xff]  ;;  %v118_v50 = vld [vmem:[%s1870_s1 + $0x310] sm:$0xff] }
  0x3c   :  { %353 = vmatpush.msrb.mxu0 %v111_v49  ;;  %372 = vmatpush.msrb.mxu1 %v196_v54  ;;  %v197_v48 = vld [vmem:[%s1870_s1 + $0x588] sm:$0xff]  ;;  %v48_v49 = vld [vmem:[%s1870_s1 + $0xe0] sm:$0xff] }
  0x3d   :  { %393 = vmatpush.msrb.mxu2 %v32_v51  ;;  %413 = vmatpush.msrb.mxu3 %v112_v56  ;;  %v203_v51 = vld [vmem:[%s1870_s1 + $0x5b8] sm:$0xff]  ;;  %v192_v52 = vld [vmem:[%s1870_s1 + $0x560] sm:$0xff]  ;;  %v113_v54 = vld [vmem:[%s1870_s1 + $0x2e8] sm:$0xff] }
  0x3e   :  { %354 = vmatpush.msrb.mxu0 %v106_v53  ;;  %373 = vmatpush.msrb.mxu1 %v191_v58  ;;  %v43_v53 = vld [vmem:[%s1870_s1 + $0xb8] sm:$0xff]  ;;  %v108_v58 = vld [vmem:[%s1870_s1 + $0x2c0] sm:$0xff] }
  0x3f   :  { %394 = vmatpush.msrb.mxu2 %v27_v55  ;;  %414 = vmatpush.msrb.mxu3 %v107_v60  ;;  %v198_v55 = vld [vmem:[%s1870_s1 + $0x590] sm:$0xff]  ;;  %v187_v56 = vld [vmem:[%s1870_s1 + $0x538] sm:$0xff] }
  0x40   :  { %355 = vmatpush.msrb.mxu0 %v101_v57  ;;  %316 = vmatmul.f32.vlgmr.msra.gmra.mxu2 %v1212_v62  ;;  %v38_v57 = vld [vmem:[%s1870_s1 + $0x90] sm:$0xff] }
  0x41   :  { %395 = vmatpush.msrb.mxu2 %v22_v59  ;;  %276 = vmatmul.f32.vlgmr.msra.gmra.mxu0 %v1207_v61  ;;  %v193_v59 = vld [vmem:[%s1870_s1 + $0x568] sm:$0xff]  ;;  %v182_v60 = vld [vmem:[%s1870_s1 + $0x510] sm:$0xff] }
  0x42   :  { %420 = vmatpush.msra.mxu0 %v257_v63  ;;  %374 = vmatpush.msrb.mxu1 %v186_v1  ;;  %v33_v63 = vld [vmem:[%s1870_s1 + $0x68] sm:$0xff]  ;;  %v188_v1 = vld [vmem:[%s1870_s1 + $0x540] sm:$0xff] }
  0x43   :  { %460 = vmatpush.msra.mxu2 %v178_v0  ;;  %415 = vmatpush.msrb.mxu3 %v102_v2  ;;  %v103_v0 = vld [vmem:[%s1870_s1 + $0x298] sm:$0xff] }
  0x44   :  { %336 = vmatmul.f32.vlgmr.msra.gmra.mxu3 %v1207_v61  ;;  %421 = vmatpush.msra.mxu0 %v252_v3  ;;  %v259_v2 = vld [vmem:[%s1870_s1 + $0x778] sm:$0xff]  ;;  %v28_v3 = vld [vmem:[%s1870_s1 + $0x40] sm:$0xff] }
  0x45   :  { %461 = vmatpush.msra.mxu2 %v173_v4  ;;  %480 = vmatpush.msra.mxu3 %v258_v5  ;;  %v183_v4 = vld [vmem:[%s1870_s1 + $0x518] sm:$0xff] }
  0x46   :  { %375 = vmatpush.msrb.mxu1 %v181_v6  ;;  %422 = vmatpush.msra.mxu0 %v247_v7  ;;  %v99_v5 = vld [vmem:[%s1870_s1 + $0x278] sm:$0xff]  ;;  %v254_v6 = vld [vmem:[%s1870_s1 + $0x750] sm:$0xff] }
  0x47   :  { %296 = vmatmul.f32.vlgmr.msra.gmra.mxu1 %v1247_v8  ;;  %462 = vmatpush.msra.mxu2 %v168_v9  ;;  %v23_v7 = vld [vmem:[%s1870_s1 + $0x18] sm:$0xff]  ;;  %v94_v9 = vld [vmem:[%s1870_s1 + $0x250] sm:$0xff] }
  0x48   :  { %440 = vmatpush.msra.mxu1 %v98_v10  ;;  %481 = vmatpush.msra.mxu3 %v253_v11  ;;  %v179_v10 = vld [vmem:[%s1870_s1 + $0x4f8] sm:$0xff]  ;;  %v249_v11 = vld [vmem:[%s1870_s1 + $0x728] sm:$0xff] }
  0x49   :  { %423 = vmatpush.msra.mxu0 %v242_v12  ;;  %463 = vmatpush.msra.mxu2 %v163_v13  ;;  %v89_v12 = vld [vmem:[%s1870_s1 + $0x228] sm:$0xff]  ;;  %v174_v13 = vld [vmem:[%s1870_s1 + $0x4d0] sm:$0xff] }
  0x4a   :  { %441 = vmatpush.msra.mxu1 %v93_v14  ;;  %482 = vmatpush.msra.mxu3 %v248_v15  ;;  %v244_v14 = vld [vmem:[%s1870_s1 + $0x700] sm:$0xff] }
  0x4b   :  { %424 = vmatpush.msra.mxu0 %v237_v16  ;;  %464 = vmatpush.msra.mxu2 %v158_v17  ;;  %v84_v15 = vld [vmem:[%s1870_s1 + $0x200] sm:$0xff]  ;;  %v580_v16 = vld [vmem:[%s1872_s2 + $0x78] sm:$0xff]  ;;  %v169_v17 = vld [vmem:[%s1870_s1 + $0x4a8] sm:$0xff] }
  0x4c   :  { %442 = vmatpush.msra.mxu1 %v88_v18  ;;  %483 = vmatpush.msra.mxu3 %v243_v19  ;;  %v239_v18 = vld [vmem:[%s1870_s1 + $0x6d8] sm:$0xff] }
  0x4d   :  { %356 = vmatmul.f32.vlgmr.msrb.gmra.mxu0 %v1247_v8  ;;  %465 = vmatpush.msra.mxu2 %v153_v20  ;;  %v79_v19 = vld [vmem:[%s1870_s1 + $0x1d8] sm:$0xff]  ;;  %v579_v20 = vld [vmem:[%s1872_s2 + $0x70] sm:$0xff] }
  0x4e   :  { %425 = vmatpush.msra.mxu0 %v232_v21  ;;  %443 = vmatpush.msra.mxu1 %v83_v22  ;;  %v164_v21 = vld [vmem:[%s1870_s1 + $0x480] sm:$0xff]  ;;  %v234_v22 = vld [vmem:[%s1870_s1 + $0x6b0] sm:$0xff] }
  0x4f   :  { %484 = vmatpush.msra.mxu3 %v238_v23  ;;  %376 = vmatmul.f32.vlgmr.msrb.gmra.mxu1 %v1212_v62  ;;  %v74_v23 = vld [vmem:[%s1870_s1 + $0x1b0] sm:$0xff] }
  0x50   :  { %426 = vmatpush.msra.mxu0 %v227_v24  ;;  %444 = vmatpush.msra.mxu1 %v78_v25  ;;  %v578_v24 = vld [vmem:[%s1872_s2 + $0x68] sm:$0xff]  ;;  %v159_v25 = vld [vmem:[%s1870_s1 + $0x458] sm:$0xff] }
  0x51   :  { %466 = vmatpush.msra.mxu2 %v148_v26  ;;  %485 = vmatpush.msra.mxu3 %v233_v27  ;;  %v229_v26 = vld [vmem:[%s1870_s1 + $0x688] sm:$0xff] }
  0x52   :  { %427 = vmatpush.msra.mxu0 %v222_v28  ;;  %445 = vmatpush.msra.mxu1 %v73_v29  ;;  %v69_v27 = vld [vmem:[%s1870_s1 + $0x188] sm:$0xff]  ;;  %v577_v28 = vld [vmem:[%s1872_s2 + $0x60] sm:$0xff]  ;;  %v154_v29 = vld [vmem:[%s1870_s1 + $0x430] sm:$0xff] }
  0x53   :  { %467 = vmatpush.msra.mxu2 %v143_v30  ;;  %486 = vmatpush.msra.mxu3 %v228_v31  ;;  %v224_v30 = vld [vmem:[%s1870_s1 + $0x660] sm:$0xff] }
  0x54   :  { %428 = vmatpush.msra.mxu0 %v217_v32  ;;  %446 = vmatpush.msra.mxu1 %v68_v33  ;;  %v64_v31 = vld [vmem:[%s1870_s1 + $0x160] sm:$0xff]  ;;  %v576_v32 = vld [vmem:[%s1872_s2 + $0x58] sm:$0xff]  ;;  %v149_v33 = vld [vmem:[%s1870_s1 + $0x408] sm:$0xff] }
  0x55   :  { %468 = vmatpush.msra.mxu2 %v138_v34  ;;  %487 = vmatpush.msra.mxu3 %v223_v35  ;;  %v219_v34 = vld [vmem:[%s1870_s1 + $0x638] sm:$0xff] }
  0x56   :  { %429 = vmatpush.msra.mxu0 %v212_v36  ;;  %447 = vmatpush.msra.mxu1 %v63_v37  ;;  %v59_v35 = vld [vmem:[%s1870_s1 + $0x138] sm:$0xff]  ;;  %v575_v36 = vld [vmem:[%s1872_s2 + $0x50] sm:$0xff]  ;;  %v144_v37 = vld [vmem:[%s1870_s1 + $0x3e0] sm:$0xff] }
  0x57   :  { %469 = vmatpush.msra.mxu2 %v133_v38  ;;  %488 = vmatpush.msra.mxu3 %v218_v39  ;;  %v214_v38 = vld [vmem:[%s1870_s1 + $0x610] sm:$0xff] }
  0x58   :  { %430 = vmatpush.msra.mxu0 %v207_v40  ;;  %448 = vmatpush.msra.mxu1 %v58_v41  ;;  %v54_v39 = vld [vmem:[%s1870_s1 + $0x110] sm:$0xff]  ;;  %v574_v40 = vld [vmem:[%s1872_s2 + $0x48] sm:$0xff]  ;;  %v139_v41 = vld [vmem:[%s1870_s1 + $0x3b8] sm:$0xff] }
  0x59   :  { %470 = vmatpush.msra.mxu2 %v128_v42  ;;  %489 = vmatpush.msra.mxu3 %v213_v43  ;;  %v209_v42 = vld [vmem:[%s1870_s1 + $0x5e8] sm:$0xff] }
  0x5a   :  { %431 = vmatpush.msra.mxu0 %v202_v44  ;;  %449 = vmatpush.msra.mxu1 %v53_v45  ;;  %v49_v43 = vld [vmem:[%s1870_s1 + $0xe8] sm:$0xff]  ;;  %v573_v44 = vld [vmem:[%s1872_s2 + $0x40] sm:$0xff]  ;;  %v134_v45 = vld [vmem:[%s1870_s1 + $0x390] sm:$0xff] }
  0x5b   :  { %471 = vmatpush.msra.mxu2 %v123_v46  ;;  %490 = vmatpush.msra.mxu3 %v208_v47  ;;  %v204_v46 = vld [vmem:[%s1870_s1 + $0x5c0] sm:$0xff] }
  0x5c   :  { %396 = vmatmul.f32.vlgmr.msrb.gmra.mxu2 %v1207_v61  ;;  %416 = vmatmul.f32.vlgmr.msrb.gmra.mxu3 %v1247_v8  ;;  %v44_v47 = vld [vmem:[%s1870_s1 + $0xc0] sm:$0xff] }
  0x5d   :  { %432 = vmatpush.msra.mxu0 %v197_v48  ;;  %450 = vmatpush.msra.mxu1 %v48_v49  ;;  %v572_v48 = vld [vmem:[%s1872_s2 + $0x38] sm:$0xff]  ;;  %v129_v49 = vld [vmem:[%s1870_s1 + $0x368] sm:$0xff] }
  0x5e   :  { %472 = vmatpush.msra.mxu2 %v118_v50  ;;  %491 = vmatpush.msra.mxu3 %v203_v51  ;;  %v199_v50 = vld [vmem:[%s1870_s1 + $0x598] sm:$0xff] }
  0x5f   :  { %433 = vmatpush.msra.mxu0 %v192_v52  ;;  %451 = vmatpush.msra.mxu1 %v43_v53  ;;  %v39_v51 = vld [vmem:[%s1870_s1 + $0x98] sm:$0xff]  ;;  %v571_v52 = vld [vmem:[%s1872_s2 + $0x30] sm:$0xff]  ;;  %v124_v53 = vld [vmem:[%s1870_s1 + $0x340] sm:$0xff] }
  0x60   :  { %473 = vmatpush.msra.mxu2 %v113_v54  ;;  %492 = vmatpush.msra.mxu3 %v198_v55  ;;  %v194_v54 = vld [vmem:[%s1870_s1 + $0x570] sm:$0xff] }
  0x61   :  { %434 = vmatpush.msra.mxu0 %v187_v56  ;;  %452 = vmatpush.msra.mxu1 %v38_v57  ;;  %v34_v55 = vld [vmem:[%s1870_s1 + $0x70] sm:$0xff]  ;;  %v570_v56 = vld [vmem:[%s1872_s2 + $0x28] sm:$0xff]  ;;  %v119_v57 = vld [vmem:[%s1870_s1 + $0x318] sm:$0xff] }
  0x62   :  { %474 = vmatpush.msra.mxu2 %v108_v58  ;;  %493 = vmatpush.msra.mxu3 %v193_v59  ;;  %v189_v58 = vld [vmem:[%s1870_s1 + $0x548] sm:$0xff] }
  0x63   :  { %435 = vmatpush.msra.mxu0 %v182_v60  ;;  %453 = vmatpush.msra.mxu1 %v33_v63  ;;  %v29_v59 = vld [vmem:[%s1870_s1 + $0x48] sm:$0xff]  ;;  %v114_v60 = vld [vmem:[%s1870_s1 + $0x2f0] sm:$0xff]  ;;  %v184_v63 = vld [vmem:[%s1870_s1 + $0x520] sm:$0xff] }
  0x64   :  { %475 = vmatpush.msra.mxu2 %v103_v0  ;;  %494 = vmatpush.msra.mxu3 %v188_v1  ;;  %v24_v0 = vld [vmem:[%s1870_s1 + $0x20] sm:$0xff]  ;;  %v109_v1 = vld [vmem:[%s1870_s1 + $0x2c8] sm:$0xff] }
  0x65   :  { %436 = vmatmul.f32.vlgmr.msra.gmra.mxu0 %v1212_v62  ;;  %476 = vmatmul.f32.vlgmr.msra.gmra.mxu2 %v1247_v8 }
  0x66   :  { %540 = vmatpush.msrb.mxu2 %v259_v2  ;;  %454 = vmatpush.msra.mxu1 %v28_v3  ;;  %v596_v2 = vld [vmem:[%s1872_s2 + $0xf8] sm:$0xff]  ;;  %v104_v3 = vld [vmem:[%s1870_s1 + $0x2a0] sm:$0xff] }
  0x67   :  { %495 = vmatpush.msra.mxu3 %v183_v4  ;;  %500 = vmatpush.msrb.mxu0 %v99_v5  ;;  %v595_v4 = vld [vmem:[%s1872_s2 + $0xf0] sm:$0xff]  ;;  %v594_v5 = vld [vmem:[%s1872_s2 + $0xe8] sm:$0xff] }
  0x68   :  { %496 = vmatmul.f32.vlgmr.msra.gmra.mxu3 %v1212_v62  ;;  %541 = vmatpush.msrb.mxu2 %v254_v6  ;;  %v591_v6 = vld [vmem:[%s1872_s2 + $0xd0] sm:$0xff] }
  0x69   :  { %455 = vmatpush.msra.mxu1 %v23_v7  ;;  %501 = vmatpush.msrb.mxu0 %v94_v9  ;;  %v589_v7 = vld [vmem:[%s1872_s2 + $0xc0] sm:$0xff] }
  0x6a   :  { %542 = vmatpush.msrb.mxu2 %v249_v11  ;;  %456 = vmatmul.f32.vlgmr.msra.gmra.mxu1 %v1207_v61  ;;  %v569_v9 = vld [vmem:[%s1872_s2 + $0x20] sm:$0xff]  ;;  %v568_v11 = vld [vmem:[%s1872_s2 + $0x18] sm:$0xff] }
  0x6b   :  { %520 = vmatpush.msrb.mxu1 %v179_v10  ;;  %502 = vmatpush.msrb.mxu0 %v89_v12  ;;  %v588_v10 = vld [vmem:[%s1872_s2 + $0xb8] sm:$0xff]  ;;  %v587_v12 = vld [vmem:[%s1872_s2 + $0xb0] sm:$0xff] }
  0x6c   :  { %543 = vmatpush.msrb.mxu2 %v244_v14  ;;  %645 = vmatpush.msrb.mxu3 %v580_v16  ;;  %v567_v14 = vld [vmem:[%s1872_s2 + $0x10] sm:$0xff] }
  0x6d   :  { %521 = vmatpush.msrb.mxu1 %v174_v13  ;;  %503 = vmatpush.msrb.mxu0 %v84_v15  ;;  %v612_v13 = vld [vmem:[%s1872_s2 + $0x178] sm:$0xff]  ;;  %v586_v15 = vld [vmem:[%s1872_s2 + $0xa8] sm:$0xff]  ;;  %v611_v16 = vld [vmem:[%s1872_s2 + $0x170] sm:$0xff] }
  0x6e   :  { %544 = vmatpush.msrb.mxu2 %v239_v18  ;;  %646 = vmatpush.msrb.mxu3 %v579_v20  ;;  %v585_v18 = vld [vmem:[%s1872_s2 + $0xa0] sm:$0xff] }
  0x6f   :  { %522 = vmatpush.msrb.mxu1 %v169_v17  ;;  %504 = vmatpush.msrb.mxu0 %v79_v19  ;;  %v566_v17 = vld [vmem:[%s1872_s2 + $0x8] sm:$0xff]  ;;  %v565_v20 = vld [vmem:[%s1872_s2] sm:$0xff] }
  0x70   :  { %545 = vmatpush.msrb.mxu2 %v234_v22  ;;  %647 = vmatpush.msrb.mxu3 %v578_v24  ;;  %v610_v19 = vld [vmem:[%s1872_s2 + $0x168] sm:$0xff]  ;;  %v609_v22 = vld [vmem:[%s1872_s2 + $0x160] sm:$0xff]  ;;  %v608_v24 = vld [vmem:[%s1872_s2 + $0x158] sm:$0xff] }
  0x71   :  { %523 = vmatpush.msrb.mxu1 %v164_v21  ;;  %505 = vmatpush.msrb.mxu0 %v74_v23  ;;  %v584_v21 = vld [vmem:[%s1872_s2 + $0x98] sm:$0xff]  ;;  %v583_v23 = vld [vmem:[%s1872_s2 + $0x90] sm:$0xff] }
  0x72   :  { %546 = vmatpush.msrb.mxu2 %v229_v26  ;;  %648 = vmatpush.msrb.mxu3 %v577_v28  ;;  %v582_v26 = vld [vmem:[%s1872_s2 + $0x88] sm:$0xff]  ;;  %v627_v28 = vld [vmem:[%s1872_s2 + $0x1f0] sm:$0xff] }
  0x73   :  { %524 = vmatpush.msrb.mxu1 %v159_v25  ;;  %506 = vmatpush.msrb.mxu0 %v69_v27  ;;  %v628_v25 = vld [vmem:[%s1872_s2 + $0x1f8] sm:$0xff]  ;;  %v607_v27 = vld [vmem:[%s1872_s2 + $0x150] sm:$0xff] }
  0x74   :  { %547 = vmatpush.msrb.mxu2 %v224_v30  ;;  %649 = vmatpush.msrb.mxu3 %v576_v32  ;;  %v626_v30 = vld [vmem:[%s1872_s2 + $0x1e8] sm:$0xff]  ;;  %v625_v32 = vld [vmem:[%s1872_s2 + $0x1e0] sm:$0xff] }
  0x75   :  { %525 = vmatpush.msrb.mxu1 %v154_v29  ;;  %507 = vmatpush.msrb.mxu0 %v64_v31  ;;  %v581_v29 = vld [vmem:[%s1872_s2 + $0x80] sm:$0xff]  ;;  %v606_v31 = vld [vmem:[%s1872_s2 + $0x148] sm:$0xff] }
  0x76   :  { %548 = vmatpush.msrb.mxu2 %v219_v34  ;;  %650 = vmatpush.msrb.mxu3 %v575_v36  ;;  %v624_v34 = vld [vmem:[%s1872_s2 + $0x1d8] sm:$0xff]  ;;  %v623_v36 = vld [vmem:[%s1872_s2 + $0x1d0] sm:$0xff] }
  0x77   :  { %526 = vmatpush.msrb.mxu1 %v149_v33  ;;  %508 = vmatpush.msrb.mxu0 %v59_v35  ;;  %v605_v33 = vld [vmem:[%s1872_s2 + $0x140] sm:$0xff]  ;;  %v604_v35 = vld [vmem:[%s1872_s2 + $0x138] sm:$0xff] }
  0x78   :  { %549 = vmatpush.msrb.mxu2 %v214_v38  ;;  %651 = vmatpush.msrb.mxu3 %v574_v40  ;;  %v622_v38 = vld [vmem:[%s1872_s2 + $0x1c8] sm:$0xff]  ;;  %v621_v40 = vld [vmem:[%s1872_s2 + $0x1c0] sm:$0xff] }
  0x79   :  { %527 = vmatpush.msrb.mxu1 %v144_v37  ;;  %509 = vmatpush.msrb.mxu0 %v54_v39  ;;  %v603_v37 = vld [vmem:[%s1872_s2 + $0x130] sm:$0xff]  ;;  %v602_v39 = vld [vmem:[%s1872_s2 + $0x128] sm:$0xff] }
  0x7a   :  { %550 = vmatpush.msrb.mxu2 %v209_v42  ;;  %652 = vmatpush.msrb.mxu3 %v573_v44  ;;  %v620_v44 = vld [vmem:[%s1872_s2 + $0x1b8] sm:$0xff] }
  0x7b   :  { %528 = vmatpush.msrb.mxu1 %v139_v41  ;;  %510 = vmatpush.msrb.mxu0 %v49_v43  ;;  %v601_v41 = vld [vmem:[%s1872_s2 + $0x120] sm:$0xff]  ;;  %v600_v43 = vld [vmem:[%s1872_s2 + $0x118] sm:$0xff] }
  0x7c   :  { %551 = vmatpush.msrb.mxu2 %v204_v46  ;;  %653 = vmatpush.msrb.mxu3 %v572_v48  ;;  %v619_v46 = vld [vmem:[%s1872_s2 + $0x1b0] sm:$0xff] }
  0x7d   :  { %529 = vmatpush.msrb.mxu1 %v134_v45  ;;  %511 = vmatpush.msrb.mxu0 %v44_v47  ;;  %v599_v45 = vld [vmem:[%s1872_s2 + $0x110] sm:$0xff] }
  0x7e   :  { %552 = vmatpush.msrb.mxu2 %v199_v50  ;;  %654 = vmatpush.msrb.mxu3 %v571_v52  ;;  %v618_v50 = vld [vmem:[%s1872_s2 + $0x1a8] sm:$0xff]  ;;  %v597_v52 = vld [vmem:[%s1872_s2 + $0x100] sm:$0xff] }
  0x7f   :  { %530 = vmatpush.msrb.mxu1 %v129_v49  ;;  %512 = vmatpush.msrb.mxu0 %v39_v51  ;;  %v598_v49 = vld [vmem:[%s1872_s2 + $0x108] sm:$0xff] }
  0x80   :  { %553 = vmatpush.msrb.mxu2 %v194_v54  ;;  %655 = vmatpush.msrb.mxu3 %v570_v56  ;;  %v616_v56 = vld [vmem:[%s1872_s2 + $0x198] sm:$0xff] }
  0x81   :  { %531 = vmatpush.msrb.mxu1 %v124_v53  ;;  %513 = vmatpush.msrb.mxu0 %v34_v55  ;;  %v617_v53 = vld [vmem:[%s1872_s2 + $0x1a0] sm:$0xff] }
  0x82   :  { %554 = vmatpush.msrb.mxu2 %v189_v58  ;;  %656 = vmatpush.msrb.mxu3 %v569_v9  ;;  %v637_v9 = vld [vmem:[%s1872_s2 + $0x240] sm:$0xff] }
  0x83   :  { %532 = vmatpush.msrb.mxu1 %v119_v57  ;;  %514 = vmatpush.msrb.mxu0 %v29_v59  ;;  %v615_v59 = vld [vmem:[%s1872_s2 + $0x190] sm:$0xff] }
  0x84   :  { %555 = vmatpush.msrb.mxu2 %v184_v63  ;;  %657 = vmatpush.msrb.mxu3 %v568_v11  ;;  %v635_v11 = vld [vmem:[%s1872_s2 + $0x230] sm:$0xff] }
  0x85   :  { %533 = vmatpush.msrb.mxu1 %v114_v60  ;;  %556 = vmatmul.f32.vlgmr.msrb.gmra.mxu2 %v1212_v62  ;;  %v593_v62 = vld [vmem:[%s1872_s2 + $0xe0] sm:$0xff] }
  0x86   :  { %515 = vmatpush.msrb.mxu0 %v24_v0  ;;  %658 = vmatpush.msrb.mxu3 %v567_v14  ;;  %v614_v0 = vld [vmem:[%s1872_s2 + $0x188] sm:$0xff] }
  0x87   :  { %534 = vmatpush.msrb.mxu1 %v109_v1  ;;  %516 = vmatmul.f32.vlgmr.msrb.gmra.mxu0 %v1207_v61  ;;  %v592_v61 = vld [vmem:[%s1872_s2 + $0xd8] sm:$0xff]  ;;  %v634_v14 = vld [vmem:[%s1872_s2 + $0x228] sm:$0xff] }
  0x88   :  { %665 = vmatpush.msra.mxu0 %v596_v2  ;;  %659 = vmatpush.msrb.mxu3 %v566_v17  ;;  %v644_v2 = vld [vmem:[%s1872_s2 + $0x278] sm:$0xff] }
  0x89   :  { %535 = vmatpush.msrb.mxu1 %v104_v3  ;;  %705 = vmatpush.msra.mxu2 %v628_v25  ;;  %v613_v3 = vld [vmem:[%s1872_s2 + $0x180] sm:$0xff]  ;;  %v630_v25 = vld [vmem:[%s1872_s2 + $0x208] sm:$0xff] }
  0x8a   :  { %536 = vmatmul.f32.vlgmr.msrb.gmra.mxu1 %v1247_v8  ;;  %666 = vmatpush.msra.mxu0 %v595_v4  ;;  %v590_v8 = vld [vmem:[%s1872_s2 + $0xc8] sm:$0xff] }
  0x8b   :  { %685 = vmatpush.msra.mxu1 %v612_v13  ;;  %660 = vmatpush.msrb.mxu3 %v565_v20  ;;  %v632_v20 = vld [vmem:[%s1872_s2 + $0x218] sm:$0xff] }
  0x8c   :  { %667 = vmatpush.msra.mxu0 %v594_v5  ;;  %706 = vmatpush.msra.mxu2 %v627_v28  ;;  %v643_v5 = vld [vmem:[%s1872_s2 + $0x270] sm:$0xff] }
  0x8d   :  { %686 = vmatpush.msra.mxu1 %v611_v16  ;;  %725 = vmatpush.msra.mxu3 %v644_v2  ;;  %v633_v16 = vld [vmem:[%s1872_s2 + $0x220] sm:$0xff] }
  0x8e   :  { %668 = vmatpush.msra.mxu0 %v593_v62  ;;  %707 = vmatpush.msra.mxu2 %v626_v30  ;;  %v642_v62 = vld [vmem:[%s1872_s2 + $0x268] sm:$0xff] }
  0x8f   :  { %687 = vmatpush.msra.mxu1 %v610_v19  ;;  %726 = vmatpush.msra.mxu3 %v643_v5 }
  0x90   :  { %669 = vmatpush.msra.mxu0 %v592_v61  ;;  %708 = vmatpush.msra.mxu2 %v625_v32  ;;  %v641_v61 = vld [vmem:[%s1872_s2 + $0x260] sm:$0xff] }
  0x91   :  { %688 = vmatpush.msra.mxu1 %v609_v22  ;;  %727 = vmatpush.msra.mxu3 %v642_v62 }
  0x92   :  { %670 = vmatpush.msra.mxu0 %v591_v6  ;;  %709 = vmatpush.msra.mxu2 %v624_v34  ;;  %v640_v6 = vld [vmem:[%s1872_s2 + $0x258] sm:$0xff] }
  0x93   :  { %689 = vmatpush.msra.mxu1 %v608_v24  ;;  %728 = vmatpush.msra.mxu3 %v641_v61 }
  0x94   :  { %671 = vmatpush.msra.mxu0 %v590_v8  ;;  %710 = vmatpush.msra.mxu2 %v623_v36  ;;  %v639_v8 = vld [vmem:[%s1872_s2 + $0x250] sm:$0xff]  ;;  %v761_v36 = vld [vmem:[%s1873_s3 + $0x78] sm:$0xff] }
  0x95   :  { %690 = vmatpush.msra.mxu1 %v607_v27  ;;  %729 = vmatpush.msra.mxu3 %v640_v6  ;;  %v629_v27 = vld [vmem:[%s1872_s2 + $0x200] sm:$0xff] }
  0x96   :  { %672 = vmatpush.msra.mxu0 %v589_v7  ;;  %711 = vmatpush.msra.mxu2 %v622_v38  ;;  %v638_v7 = vld [vmem:[%s1872_s2 + $0x248] sm:$0xff] }
  0x97   :  { %691 = vmatpush.msra.mxu1 %v606_v31  ;;  %730 = vmatpush.msra.mxu3 %v639_v8  ;;  %v759_v38 = vld [vmem:[%s1873_s3 + $0x68] sm:$0xff] }
  0x98   :  { %673 = vmatpush.msra.mxu0 %v588_v10  ;;  %712 = vmatpush.msra.mxu2 %v621_v40  ;;  %v636_v10 = vld [vmem:[%s1872_s2 + $0x238] sm:$0xff] }
  0x99   :  { %692 = vmatpush.msra.mxu1 %v605_v33  ;;  %731 = vmatpush.msra.mxu3 %v638_v7  ;;  %v757_v40 = vld [vmem:[%s1873_s3 + $0x58] sm:$0xff] }
  0x9a   :  { %674 = vmatpush.msra.mxu0 %v587_v12  ;;  %713 = vmatpush.msra.mxu2 %v620_v44  ;;  %v753_v44 = vld [vmem:[%s1873_s3 + $0x38] sm:$0xff] }
  0x9b   :  { %693 = vmatpush.msra.mxu1 %v604_v35  ;;  %732 = vmatpush.msra.mxu3 %v637_v9 }
  0x9c   :  { %675 = vmatpush.msra.mxu0 %v586_v15  ;;  %714 = vmatpush.msra.mxu2 %v619_v46  ;;  %v751_v46 = vld [vmem:[%s1873_s3 + $0x28] sm:$0xff] }
  0x9d   :  { %694 = vmatpush.msra.mxu1 %v603_v37  ;;  %733 = vmatpush.msra.mxu3 %v636_v10  ;;  %v760_v37 = vld [vmem:[%s1873_s3 + $0x70] sm:$0xff] }
  0x9e   :  { %676 = vmatpush.msra.mxu0 %v585_v18  ;;  %715 = vmatpush.msra.mxu2 %v618_v50  ;;  %v747_v50 = vld [vmem:[%s1873_s3 + $0x8] sm:$0xff] }
  0x9f   :  { %695 = vmatpush.msra.mxu1 %v602_v39  ;;  %734 = vmatpush.msra.mxu3 %v635_v11  ;;  %v758_v39 = vld [vmem:[%s1873_s3 + $0x60] sm:$0xff] }
  0xa0   :  { %677 = vmatpush.msra.mxu0 %v584_v21  ;;  %716 = vmatpush.msra.mxu2 %v617_v53  ;;  %v631_v21 = vld [vmem:[%s1872_s2 + $0x210] sm:$0xff] }
  0xa1   :  { %696 = vmatpush.msra.mxu1 %v601_v41  ;;  %735 = vmatpush.msra.mxu3 %v634_v14  ;;  %v756_v41 = vld [vmem:[%s1873_s3 + $0x50] sm:$0xff] }
  0xa2   :  { %678 = vmatpush.msra.mxu0 %v583_v23  ;;  %717 = vmatpush.msra.mxu2 %v616_v56 }
  0xa3   :  { %697 = vmatpush.msra.mxu1 %v600_v43  ;;  %736 = vmatpush.msra.mxu3 %v633_v16  ;;  %v754_v43 = vld [vmem:[%s1873_s3 + $0x40] sm:$0xff] }
  0xa4   :  { %679 = vmatpush.msra.mxu0 %v582_v26  ;;  %718 = vmatpush.msra.mxu2 %v615_v59 }
  0xa5   :  { %698 = vmatpush.msra.mxu1 %v599_v45  ;;  %737 = vmatpush.msra.mxu3 %v632_v20  ;;  %v752_v45 = vld [vmem:[%s1873_s3 + $0x30] sm:$0xff] }
  0xa6   :  { %680 = vmatpush.msra.mxu0 %v581_v29  ;;  %719 = vmatpush.msra.mxu2 %v614_v0  ;;  %v782_v0 = vlaneseq }
  0xa7   :  { %699 = vmatpush.msra.mxu1 %v598_v49  ;;  %738 = vmatpush.msra.mxu3 %v631_v21  ;;  %v748_v49 = vld [vmem:[%s1873_s3 + $0x10] sm:$0xff] }
  0xa8   :  { %720 = vmatpush.msra.mxu2 %v613_v3  ;;  %762 = vmatpush.msrb.mxu0 %v761_v36 }
  0xa9   :  { %700 = vmatpush.msra.mxu1 %v597_v52  ;;  %739 = vmatpush.msra.mxu3 %v630_v25 }
  0xaa   :  { %763 = vmatpush.msrb.mxu0 %v760_v37 }
  0xab   :  { %740 = vmatpush.msra.mxu3 %v629_v27 }
  0xac   :  { %764 = vmatpush.msrb.mxu0 %v759_v38 }
  0xae   :  { %765 = vmatpush.msrb.mxu0 %v758_v39 }
  0xb0   :  { %766 = vmatpush.msrb.mxu0 %v757_v40 }
  0xb2   :  { %767 = vmatpush.msrb.mxu0 %v756_v41 }
  0xbe   :  { %v277_v42 = vpop.f32.mrf.mxu0 }
  0xc3   :  { %v317_v48 = vpop.f32.mrf.mxu2 }
  0xc4   :  { %v297_v47 = vpop.f32.mrf.mxu1 }
  0xc5   :  { %v298_v51 = vadd.f32 %v297_v47, %v277_v42  ;;  %v755_v42 = vld [vmem:[%s1873_s3 + $0x48] sm:$0xff]  ;;  %v750_v47 = vld [vmem:[%s1873_s3 + $0x20] sm:$0xff] }
  0xc6   :  { %768 = vmatpush.msrb.mxu0 %v755_v42 }
  0xc7   :  { %v318_v54 = vadd.f32 %v317_v48, %v298_v51  ;;  %v337_v55 = vpop.f32.mrf.mxu3  ;;  %v749_v48 = vld [vmem:[%s1873_s3 + $0x18] sm:$0xff]  ;;  %v746_v51 = vld [vmem:[%s1873_s3] sm:$0xff] }
  0xc8   :  { %769 = vmatpush.msrb.mxu0 %v754_v43 }
  0xc9   :  { %v560_v57 = vmax.f32 %v318_v54, 0.0 }
  0xca   :  { %v357_v58 = vpop.f32.mrf.mxu0  ;;  %770 = vmatpush.msrb.mxu0 %v753_v44 }
  0xcb   :  { %v358_v60 = vadd.f32 %v357_v58, %v337_v55  ;;  %661 = vmatmul.f32.vlgmr.msrb.gmra.mxu3 %v560_v57 }
  0xcc   :  { %v377_v63 = vpop.f32.mrf.mxu1  ;;  %771 = vmatpush.msrb.mxu0 %v752_v45 }
  0xcd   :  { %v378_v1 = vadd.f32 %v377_v63, %v358_v60 }
  0xce   :  { %772 = vmatpush.msrb.mxu0 %v751_v46 }
  0xcf   :  { %v561_v4 = vmax.f32 %v378_v1, 0.0  ;;  %v783_v1 = vand.u32 127, %v782_v0 }
  0xd0   :  { %773 = vmatpush.msrb.mxu0 %v750_v47 }
  0xd1   :  { %681 = vmatmul.f32.vlgmr.msra.gmra.mxu0 %v561_v4  ;;  %vm784_vm0 = vcmp.lt.s32.totalorder %v783_v1, 4 }
  0xd2   :  { %774 = vmatpush.msrb.mxu0 %v749_v48 }
  0xd4   :  { %775 = vmatpush.msrb.mxu0 %v748_v49 }
  0xd6   :  { %776 = vmatpush.msrb.mxu0 %v747_v50 }
  0xd8   :  { %777 = vmatpush.msrb.mxu0 %v746_v51 }
  0xdf   :  { %v397_v12 = vpop.f32.mrf.mxu2  ;;  %v417_v13 = vpop.f32.mrf.mxu3 }
  0xe0   :  { %v418_v15 = vadd.f32 %v417_v13, %v397_v12 }
  0xe2   :  { %v437_v17 = vpop.f32.mrf.mxu0 }
  0xe3   :  { %v438_v18 = vadd.f32 %v437_v17, %v418_v15 }
  0xe5   :  { %v562_v19 = vmax.f32 %v438_v18, 0.0 }
  0xe7   :  { %701 = vmatmul.f32.vlgmr.msra.gmra.mxu1 %v562_v19  ;;  %v457_v22 = vpop.f32.mrf.mxu1 }
  0xe8   :  { %v477_v23 = vpop.f32.mrf.mxu2 }
  0xe9   :  { %v478_v24 = vadd.f32 %v477_v23, %v457_v22 }
  0xeb   :  { %v497_v26 = vpop.f32.mrf.mxu3 }
  0xec   :  { %v498_v28 = vadd.f32 %v497_v26, %v478_v24 }
  0xee   :  { %v563_v29 = vmax.f32 %v498_v28, 0.0 }
  0xf0   :  { %721 = vmatmul.f32.vlgmr.msra.gmra.mxu2 %v563_v29 }
 0x104   :  { %v517_v30 = vpop.f32.mrf.mxu0 }
 0x107   :  { %v537_v31 = vpop.f32.mrf.mxu1 }
 0x108   :  { %v538_v32 = vadd.f32 %v537_v31, %v517_v30  ;;  %v557_v33 = vpop.f32.mrf.mxu2 }
 0x10a   :  { %v558_v34 = vadd.f32 %v557_v33, %v538_v32 }
 0x10c   :  { %v564_v35 = vmax.f32 %v558_v34, 0.0 }
 0x10e   :  { %741 = vmatmul.f32.vlgmr.msra.gmra.mxu3 %v564_v35 }
 0x14e   :  { %v662_v52 = vpop.f32.mrf.mxu3  ;;  %v682_v53 = vpop.f32.mrf.mxu0 }
 0x14f   :  { %v683_v55 = vadd.f32 %v682_v53, %v662_v52 }
 0x164   :  { %v702_v54 = vpop.f32.mrf.mxu1 }
 0x165   :  { %v703_v57 = vadd.f32 %v702_v54, %v683_v55 }
 0x173   :  { %v722_v56 = vpop.f32.mrf.mxu2 }
 0x174   :  { %v723_v58 = vadd.f32 %v722_v56, %v703_v57 }
 0x191   :  { %v742_v59 = vpop.f32.mrf.mxu3 }
 0x192   :  { %v743_v60 = vadd.f32 %v742_v59, %v723_v58 }
 0x194   :  { %v745_v63 = vmax.f32 %v743_v60, 0.0 }
 0x196   :  { %778 = vmatmul.f32.vlgmr.msrb.gmra.mxu0 %v745_v63 }
 0x213   :  { %v779_v2 = vpop.f32.mrf.mxu0 }
 0x214   :  { %v785_v3 = vsel %vm784_vm0, %v779_v2, -1e+30 }
 0x215   :  { %786 = vmax.xlane.f32.xlu0 %v785_v3 }
 0x288   :  { %v787_v4 = vpop.xlane.xlu0 %786 }
 0x289   :  { %v788_v5 = vsub.f32 %v785_v3, %v787_v4 }
 0x28b   :  { %v789_v62 = vmul.f32 1.442695, %v788_v5 }
 0x28d   :  { %800 = vpow2.f32 %v789_v62 }
 0x293   :  { %v801_v61 = vpop.eup %800 }
 0x294   :  { %791 = vadd.xlane.f32.xlu0 %v801_v61 }
 0x307   :  { %v792_v6 = vpop.xlane.xlu0 %791 }
 0x308   :  { %802 = vrcp.f32 %v792_v6 }
 0x30e   :  { %v803_v8 = vpop.eup %802 }
 0x30f   :  { %v794_v7 = vmul.f32 %v803_v8, %v801_v61 }
 0x311   :  { %795 = vst [vmem:[%s1874_s4] sm:$0xff] %v794_v7 }

</bundles_post_ra>
